<compile_context>
chip_gen: v5e
topology: v5e:2x2
jax: 0.10.0
libtpu: 0.0.40
codegen_flags: <defaults>
</compile_context>

<pallas_src>
import jax
import jax.numpy as jnp
import numpy as np
from jax.experimental import pallas as pl
from jax.experimental.pallas import tpu as pltpu


# ------------------------------ sizing helpers ----------------------------- #

def _vmem_limit_bytes():
    """~75% of this generation's physical VMEM (64 MiB fallback -> 48 MiB)."""
    cap = 64 * 1024 * 1024
    try:
        info = pltpu.get_tpu_info()
        cap = int(getattr(info, "vmem_capacity_bytes", cap)) or cap
    except Exception:
        pass
    return max(32 * 1024 * 1024, (cap * 3) // 4)


def _pick_row_tile(n, max_tile, align=8):
    """Largest divisor of n that is a multiple of `align` and <= max_tile.
    Falls back to n itself (a full-extent block is always layout-legal)."""
    align = max(int(align), 1)
    max_tile = max(int(max_tile), align)
    if n <= max_tile:
        return n
    t = (max_tile // align) * align
    while t >= align:
        if n % t == 0:
            return t
        t -= align
    return n


def _knn_row_tile(n, c, budget):
    # In-kernel working set ~ a handful of (tm, n) f32 arrays (scores, iota,
    # candidates, temporaries) + the double-buffered (n, c) key block.
    keys_bytes = 2 * n * c * 4
    avail = max(budget - keys_bytes, budget // 4)
    max_tm = max(8, avail // (24 * max(n, 1)))
    return _pick_row_tile(n, min(max_tm, 1024), align=8)


def _post_row_tile(n, k, cout, budget):
    # Double-buffered (n, cout) neighbor table + per-row cost of the
    # double-buffered (tm, k*cout) output slab, gathered pieces, p1, idx.
    table_bytes = 2 * n * cout * 4
    avail = max(budget - table_bytes, budget // 4)
    per_row = (4 * k * cout + 4 * cout + 4 * k) * 4
    max_tm = max(128, avail // max(per_row, 1))
    # 128-aligned so the transposed index block (1, k, tm) stays lane-legal.
    return _pick_row_tile(n, min(max_tm, 2048), align=128)


# ------------------ fused pairwise distance + dilated kNN ------------------ #

def _make_knn_kernel(k, d):
    n_iter = (k - 1) * d + 1        # last selection we actually need

    def kernel(q_ref, key_ref, idx_ref):
        # q_ref: (1, tm, C) queries; key_ref: (1, N, C) all keys of this batch.
        q = q_ref[0]
        ky = key_ref[0]
        inner = jax.lax.dot_general(q, ky, (((1,), (1,)), ((), ())),
                                    preferred_element_type=jnp.float32)  # (tm, N)
        q_sq = jnp.sum(q * q, axis=-1, keepdims=True)                    # (tm, 1)
        k_sq = jnp.sum(ky * ky, axis=-1)[None, :]                        # (1, N)
        scores = q_sq - 2.0 * inner + k_sq                               # (tm, N)

        n_keys = scores.shape[1]
        col = jax.lax.broadcasted_iota(jnp.int32, scores.shape, 1)
        col = col.astype(jnp.float32)          # exact integers, f32 reductions only
        sentinel = jnp.float32(n_keys)
        big = jnp.float32(jnp.finfo(jnp.float32).max)

        # Iterative masked-argmin; first-occurrence tie-break matches the
        # stable ordering of lax.top_k on negated distances.
        sels = []
        for j in range(n_iter):
            m = jnp.min(scores, axis=-1, keepdims=True)            # (tm, 1)
            cand = jnp.where(scores <= m, col, sentinel)           # (tm, N)
            sel = jnp.min(cand, axis=-1, keepdims=True)            # (tm, 1)
            if j % d == 0:                                         # dilation
                sels.append(sel)
            if j + 1 < n_iter:
                scores = jnp.where(col == sel, big, scores)
        idx_ref[0] = jnp.concatenate(sels, axis=1).astype(jnp.int32)   # (tm, k)

    return kernel


def knn_select(points, k, d, tm, vmem_limit):
    B, N, C = points.shape
    return pl.pallas_call(
        _make_knn_kernel(k, d),
        out_shape=jax.ShapeDtypeStruct((B, N, k), jnp.int32),
        grid=(B, N // tm),
        in_specs=[
            pl.BlockSpec((1, tm, C), lambda b, i: (b, i, 0)),
            pl.BlockSpec((1, N, C), lambda b, i: (b, 0, 0)),
        ],
        out_specs=pl.BlockSpec((1, tm, k), lambda b, i: (b, i, 0)),
        compiler_params=pltpu.CompilerParams(
            dimension_semantics=("parallel", "parallel"),
            vmem_limit_bytes=vmem_limit),
    )(points, points)


# ------------------ fused per-point projections P1 / P2 -------------------- #

def _point_proj_kernel(x_ref, w_ref, b_ref, p1_ref, p2_ref):
    x = x_ref[0]                                               # (tm, C)
    y = jnp.dot(x, w_ref[...], preferred_element_type=jnp.float32)  # (tm, 2*Cout)
    cout = p1_ref.shape[-1]
    p1_ref[0] = y[:, :cout] + b_ref[...]                       # central proj + bias
    p2_ref[0] = y[:, cout:]                                    # neighbor proj


def point_projections(points, w_cat, bias, tm, vmem_limit):
    B, N, C = points.shape
    two_cout = w_cat.shape[1]
    cout = two_cout // 2
    return pl.pallas_call(
        _point_proj_kernel,
        out_shape=(jax.ShapeDtypeStruct((B, N, cout), jnp.float32),
                   jax.ShapeDtypeStruct((B, N, cout), jnp.float32)),
        grid=(B, N // tm),
        in_specs=[
            pl.BlockSpec((1, tm, C), lambda b, i: (b, i, 0)),
            pl.BlockSpec((C, two_cout), lambda b, i: (0, 0)),
            pl.BlockSpec((1, cout), lambda b, i: (0, 0)),
        ],
        out_specs=(pl.BlockSpec((1, tm, cout), lambda b, i: (b, i, 0)),
                   pl.BlockSpec((1, tm, cout), lambda b, i: (b, i, 0))),
        compiler_params=pltpu.CompilerParams(
            dimension_semantics=("parallel", "parallel"),
            vmem_limit_bytes=vmem_limit),
    )(points, w_cat, bias)


# -------- pass 1: centered BatchNorm batch statistics (sum / sumsq) -------- #

def _edge_stats_kernel(idx_ref, p1_ref, p2_ref, center_ref, stats_ref):
    i = pl.program_id(1)
    p1 = p1_ref[0]                        # (tm, Cout) central proj (+conv bias)
    p2 = p2_ref[0]                        # (N, Cout)  neighbor proj table
    c = center_ref[...]                   # (1, Cout)  numerical centering
    kk = idx_ref.shape[1]
    cout = p1.shape[-1]

    p1c = p1 - c
    s = jnp.zeros((1, cout), jnp.float32)
    ss = jnp.zeros((1, cout), jnp.float32)
    for j in range(kk):                   # k is small & static -> unrolled
        idx_j = idx_ref[0, j, :]          # lane-dense (tm,) index row
        yc = p1c + jnp.take(p2, idx_j, axis=0, mode="clip")
        s = s + jnp.sum(yc, axis=0, keepdims=True)
        ss = ss + jnp.sum(yc * yc, axis=0, keepdims=True)
    upd = jnp.concatenate([s, ss], axis=0)[None]               # (1, 2, Cout)

    @pl.when(i == 0)
    def _init():
        stats_ref[...] = upd

    @pl.when(i > 0)
    def _acc():
        stats_ref[...] = stats_ref[...] + upd


def edge_bn_stats(nn_idx_t, p1, p2, center, tm, vmem_limit):
    B, k, N = nn_idx_t.shape
    Cout = p1.shape[-1]
    return pl.pallas_call(
        _edge_stats_kernel,
        out_shape=jax.ShapeDtypeStruct((B, 2, Cout), jnp.float32),
        grid=(B, N // tm),
        in_specs=[
            pl.BlockSpec((1, k, tm), lambda b, i: (b, 0, i)),
            pl.BlockSpec((1, tm, Cout), lambda b, i: (b, i, 0)),
            pl.BlockSpec((1, N, Cout), lambda b, i: (b, 0, 0)),
            pl.BlockSpec((1, Cout), lambda b, i: (0, 0)),
        ],
        out_specs=pl.BlockSpec((1, 2, Cout), lambda b, i: (b, 0, 0)),
        compiler_params=pltpu.CompilerParams(
            dimension_semantics=("parallel", "arbitrary"),   # i is a reduction
            vmem_limit_bytes=vmem_limit),
    )(nn_idx_t, p1, p2, center)


# ---- pass 2: gather + BN affine + LeakyReLU, lane-dense single store ------ #

def _edge_apply_kernel(idx_ref, p1_ref, p2_ref, scale_ref, shift_ref, o_ref):
    p1 = p1_ref[0]                        # (tm, Cout)
    p2 = p2_ref[0]                        # (N, Cout)
    kk = idx_ref.shape[1]

    parts = []
    for j in range(kk):                   # static unroll over neighbors
        idx_j = idx_ref[0, j, :]          # lane-dense (tm,) index row
        parts.append(p1 + jnp.take(p2, idx_j, axis=0, mode="clip"))
    y = jnp.concatenate(parts, axis=1)                         # (tm, k*Cout)
    yn = y * scale_ref[...] + shift_ref[...]                   # pre-tiled affine
    o_ref[0] = jnp.where(yn > 0, yn, 0.2 * yn)                 # one dense store


def edge_bn_apply(nn_idx_t, p1, p2, scale_t, shift_t, tm, vmem_limit):
    B, k, N = nn_idx_t.shape
    Cout = p1.shape[-1]
    kc = k * Cout
    return pl.pallas_call(
        _edge_apply_kernel,
        out_shape=jax.ShapeDtypeStruct((B, N, kc), jnp.float32),
        grid=(B, N // tm),
        in_specs=[
            pl.BlockSpec((1, k, tm), lambda b, i: (b, 0, i)),
            pl.BlockSpec((1, tm, Cout), lambda b, i: (b, i, 0)),
            pl.BlockSpec((1, N, Cout), lambda b, i: (b, 0, 0)),
            pl.BlockSpec((1, kc), lambda b, i: (0, 0)),
            pl.BlockSpec((1, kc), lambda b, i: (0, 0)),
        ],
        out_specs=pl.BlockSpec((1, tm, kc), lambda b, i: (b, i, 0)),
        compiler_params=pltpu.CompilerParams(
            dimension_semantics=("parallel", "parallel"),
            vmem_limit_bytes=vmem_limit),
    )(nn_idx_t, p1, p2, scale_t, shift_t)


# ------------------------------ module forward ----------------------------- #

def edge_conv_forward(new_points, k, d, conv_w, conv_b, bn_gamma, bn_beta,
                      eps=1e-5):
    """new_points: (B, N, C) float32 -> (B, N, k, C_out) float32."""
    B, N, C = new_points.shape
    Cout = conv_w.shape[0]
    assert k * d <= N, "need k*d <= number of points"

    vmem_limit = _vmem_limit_bytes()
    tm_knn = _knn_row_tile(N, C, vmem_limit)
    tm_proj = _pick_row_tile(N, 1024, align=8)
    tm_post = _post_row_tile(N, k, Cout, vmem_limit)
    assert N % tm_knn == 0 and N % tm_proj == 0 and N % tm_post == 0

    # 1) fused pairwise distances + dilated kNN selection (adj stays in VMEM).
    nn_idx = knn_select(new_points, k, d, tm_knn, vmem_limit)   # (B, N, k) i32
    nn_idx_t = jnp.transpose(nn_idx, (0, 2, 1))                 # (B, k, N)

    # 2) P1/P2 trick: y = central@(W1-W2)^T + neighbor@W2^T + b, one fused dot.
    w = conv_w.reshape(Cout, 2 * C).astype(jnp.float32)
    w1t = w[:, :C].T                                            # (C, Cout)
    w2t = w[:, C:].T                                            # (C, Cout)
    w_cat = jnp.concatenate([w1t - w2t, w2t], axis=1)           # (C, 2*Cout)
    p1, p2 = point_projections(new_points, w_cat,
                               conv_b.reshape(1, Cout).astype(jnp.float32),
                               tm_proj, vmem_limit)

    # 3) pass 1: centered global BatchNorm batch statistics over B*N*k edges.
    center = jnp.mean(p1 + p2, axis=(0, 1)).reshape(1, Cout)    # conditioning only
    stats = edge_bn_stats(nn_idx_t, p1, p2, center, tm_post, vmem_limit)
    count = jnp.float32(B * N * k)
    total = jnp.sum(stats, axis=0)                              # (2, Cout)
    mean_c = total[0] / count                                   # E[y - center]
    var = total[1] / count - mean_c * mean_c                    # biased variance
    mean = mean_c + center.reshape(-1)
    scale = bn_gamma * jax.lax.rsqrt(var + eps)
    shift = bn_beta - mean * scale

    # Pre-tile the affine params to the lane-dense (1, k*Cout) layout.
    scale_t = jnp.tile(scale.reshape(1, Cout), (1, k))
    shift_t = jnp.tile(shift.reshape(1, Cout), (1, k))

    # 4) pass 2: gather + normalize + LeakyReLU(0.2), one dense store per tile.
    out = edge_bn_apply(nn_idx_t, p1, p2, scale_t, shift_t, tm_post, vmem_limit)
    return out.reshape(B, N, k, Cout)                           # free reshape


# ------------------------------ pure-JAX check ----------------------------- #

def _reference(new_points, k, d, conv_w, conv_b, bn_gamma, bn_beta):
    B, N, C = new_points.shape
    Cout = conv_w.shape[0]
    inner = jnp.einsum("bnc,bmc->bnm", new_points, new_points)
    sq = jnp.sum(new_points ** 2, axis=-1)
    adj = sq[:, :, None] - 2.0 * inner + sq[:, None, :]
    _, nn_idx = jax.lax.top_k(-adj, k * d)
    nn_idx = nn_idx[:, :, ::d]
    neighbors = jax.vmap(lambda p, i: p[i])(new_points, nn_idx)
    central = jnp.broadcast_to(new_points[:, :, None, :], (B, N, k, C))
    ef = jnp.concatenate([central, neighbors - central], -1).reshape(-1, 2 * C)
    y = ef @ conv_w.reshape(Cout, 2 * C).T + conv_b
    mean = y.mean(0)
    var = ((y - mean) ** 2).mean(0)
    yn = (y - mean) / jnp.sqrt(var + 1e-5) * bn_gamma + bn_beta
    out = jnp.where(yn > 0, yn, 0.2 * yn)
    return out.reshape(B, N, k, Cout)


if __name__ == "__main__":
    key = jax.random.PRNGKey(0)
    B, N, C = 2, 16, 4          # batch, points, input point-feature channels
    k, d = 4, 2                 # neighbors, dilation  (k*d <= N)
    Cin, Cout = 2 * C, 16       # edge_conv(in_channel=2C, out_channel=16)

    k1, k2, k3 = jax.random.split(key, 3)
    new_points = jax.random.normal(k1, (B, N, C), jnp.float32)
    # Conv2d(Cin, Cout, 1) + BatchNorm2d(Cout) synthetic parameters.
    conv_w = 0.1 * jax.random.normal(k2, (Cout, Cin, 1, 1), jnp.float32)
    conv_b = 0.1 * jax.random.normal(k3, (Cout,), jnp.float32)
    bn_gamma = jnp.ones((Cout,), jnp.float32)   # PyTorch default init
    bn_beta = jnp.zeros((Cout,), jnp.float32)

    out = edge_conv_forward(new_points, k, d, conv_w, conv_b, bn_gamma, bn_beta)
    out = jax.block_until_ready(out)

    ref = _reference(new_points, k, d, conv_w, conv_b, bn_gamma, bn_beta)
    assert out.shape == (B, N, k, Cout)
    assert np.allclose(np.asarray(out), np.asarray(ref), atol=1e-4, rtol=1e-4)
    print("KERNEL_OK")
</pallas_src>

<mosaic_0001>
module attributes {stable_mosaic.version = 11 : i64} {
  func.func @kernel(%arg0: i32, %arg1: i32, %arg2: memref<1x16x4xf32, #tpu.memory_space<vmem>>, %arg3: memref<1x16x4xf32, #tpu.memory_space<vmem>>, %arg4: memref<1x16x4xi32, #tpu.memory_space<vmem>>) attributes {dimension_semantics = [#tpu.dimension_semantics<parallel>, #tpu.dimension_semantics<parallel>], iteration_bounds = array<i64: 2, 1>, scalar_prefetch = 0 : i64, scratch_operands = 0 : i64, tpu.core_type = #tpu.core_type<tc>, window_params = [{transform_indices = @transform_0, window_bounds = array<i64: 1, 16, 4>}, {transform_indices = @transform_1, window_bounds = array<i64: 1, 16, 4>}, {transform_indices = @transform_2, window_bounds = array<i64: 1, 16, 4>}]} {
    %c0 = arith.constant 0 : index
    %c0_0 = arith.constant 0 : index
    %c0_1 = arith.constant 0 : index
    %0 = vector.load %arg2[%c0, %c0_0, %c0_1] : memref<1x16x4xf32, #tpu.memory_space<vmem>>, vector<1x16x4xf32>
    %1 = vector.shape_cast %0 : vector<1x16x4xf32> to vector<16x4xf32>
    %c0_2 = arith.constant 0 : index
    %c0_3 = arith.constant 0 : index
    %c0_4 = arith.constant 0 : index
    %2 = vector.load %arg3[%c0_2, %c0_3, %c0_4] : memref<1x16x4xf32, #tpu.memory_space<vmem>>, vector<1x16x4xf32>
    %3 = vector.shape_cast %2 : vector<1x16x4xf32> to vector<16x4xf32>
    %cst = arith.constant dense<0.000000e+00> : vector<16x16xf32>
    %4 = tpu.matmul %1, %3, %cst {dimension_numbers = #tpu.dot_dimension_numbers<[1], [1], [0], [0], [0, 0, 1, 0], [], []>} : vector<16x4xf32>, vector<16x4xf32>, vector<16x16xf32> -> vector<16x16xf32>
    %5 = arith.mulf %1, %1 : vector<16x4xf32>
    %cst_5 = arith.constant dense<0.000000e+00> : vector<16xf32>
    %6 = vector.multi_reduction <add>, %5, %cst_5 [1] : vector<16x4xf32> to vector<16xf32>
    %7 = vector.shape_cast %6 : vector<16xf32> to vector<16x1xf32>
    %8 = arith.mulf %3, %3 : vector<16x4xf32>
    %cst_6 = arith.constant dense<0.000000e+00> : vector<16xf32>
    %9 = vector.multi_reduction <add>, %8, %cst_6 [1] : vector<16x4xf32> to vector<16xf32>
    %10 = vector.shape_cast %9 : vector<16xf32> to vector<1x16xf32>
    %cst_7 = arith.constant 2.000000e+00 : f32
    %11 = vector.broadcast %cst_7 : f32 to vector<16x16xf32>
    %12 = arith.mulf %11, %4 : vector<16x16xf32>
    %13 = vector.broadcast %7 : vector<16x1xf32> to vector<16x16xf32>
    %14 = arith.subf %13, %12 : vector<16x16xf32>
    %15 = vector.broadcast %10 : vector<1x16xf32> to vector<16x16xf32>
    %16 = arith.addf %14, %15 : vector<16x16xf32>
    %17 = tpu.iota {dimensions = array<i32: 1>} : vector<16x16xi32>
    %18 = arith.sitofp %17 : vector<16x16xi32> to vector<16x16xf32>
    %cst_8 = arith.constant dense<0x7F800000> : vector<16xf32>
    %19 = vector.multi_reduction <minimumf>, %16, %cst_8 [1] : vector<16x16xf32> to vector<16xf32>
    %20 = vector.shape_cast %19 : vector<16xf32> to vector<16x1xf32>
    %21 = vector.broadcast %20 : vector<16x1xf32> to vector<16x16xf32>
    %22 = arith.cmpf ole, %16, %21 : vector<16x16xf32>
    %cst_9 = arith.constant 1.600000e+01 : f32
    %23 = vector.broadcast %cst_9 : f32 to vector<16x16xf32>
    %24 = arith.select %22, %18, %23 : vector<16x16xi1>, vector<16x16xf32>
    %cst_10 = arith.constant dense<0x7F800000> : vector<16xf32>
    %25 = vector.multi_reduction <minimumf>, %24, %cst_10 [1] : vector<16x16xf32> to vector<16xf32>
    %26 = vector.shape_cast %25 : vector<16xf32> to vector<16x1xf32>
    %27 = vector.broadcast %26 : vector<16x1xf32> to vector<16x16xf32>
    %28 = arith.cmpf oeq, %18, %27 : vector<16x16xf32>
    %cst_11 = arith.constant 3.40282347E+38 : f32
    %29 = vector.broadcast %cst_11 : f32 to vector<16x16xf32>
    %30 = arith.select %28, %29, %16 : vector<16x16xi1>, vector<16x16xf32>
    %cst_12 = arith.constant dense<0x7F800000> : vector<16xf32>
    %31 = vector.multi_reduction <minimumf>, %30, %cst_12 [1] : vector<16x16xf32> to vector<16xf32>
    %32 = vector.shape_cast %31 : vector<16xf32> to vector<16x1xf32>
    %33 = vector.broadcast %32 : vector<16x1xf32> to vector<16x16xf32>
    %34 = arith.cmpf ole, %30, %33 : vector<16x16xf32>
    %cst_13 = arith.constant 1.600000e+01 : f32
    %35 = vector.broadcast %cst_13 : f32 to vector<16x16xf32>
    %36 = arith.select %34, %18, %35 : vector<16x16xi1>, vector<16x16xf32>
    %cst_14 = arith.constant dense<0x7F800000> : vector<16xf32>
    %37 = vector.multi_reduction <minimumf>, %36, %cst_14 [1] : vector<16x16xf32> to vector<16xf32>
    %38 = vector.shape_cast %37 : vector<16xf32> to vector<16x1xf32>
    %39 = vector.broadcast %38 : vector<16x1xf32> to vector<16x16xf32>
    %40 = arith.cmpf oeq, %18, %39 : vector<16x16xf32>
    %cst_15 = arith.constant 3.40282347E+38 : f32
    %41 = vector.broadcast %cst_15 : f32 to vector<16x16xf32>
    %42 = arith.select %40, %41, %30 : vector<16x16xi1>, vector<16x16xf32>
    %cst_16 = arith.constant dense<0x7F800000> : vector<16xf32>
    %43 = vector.multi_reduction <minimumf>, %42, %cst_16 [1] : vector<16x16xf32> to vector<16xf32>
    %44 = vector.shape_cast %43 : vector<16xf32> to vector<16x1xf32>
    %45 = vector.broadcast %44 : vector<16x1xf32> to vector<16x16xf32>
    %46 = arith.cmpf ole, %42, %45 : vector<16x16xf32>
    %cst_17 = arith.constant 1.600000e+01 : f32
    %47 = vector.broadcast %cst_17 : f32 to vector<16x16xf32>
    %48 = arith.select %46, %18, %47 : vector<16x16xi1>, vector<16x16xf32>
    %cst_18 = arith.constant dense<0x7F800000> : vector<16xf32>
    %49 = vector.multi_reduction <minimumf>, %48, %cst_18 [1] : vector<16x16xf32> to vector<16xf32>
    %50 = vector.shape_cast %49 : vector<16xf32> to vector<16x1xf32>
    %51 = vector.broadcast %50 : vector<16x1xf32> to vector<16x16xf32>
    %52 = arith.cmpf oeq, %18, %51 : vector<16x16xf32>
    %cst_19 = arith.constant 3.40282347E+38 : f32
    %53 = vector.broadcast %cst_19 : f32 to vector<16x16xf32>
    %54 = arith.select %52, %53, %42 : vector<16x16xi1>, vector<16x16xf32>
    %cst_20 = arith.constant dense<0x7F800000> : vector<16xf32>
    %55 = vector.multi_reduction <minimumf>, %54, %cst_20 [1] : vector<16x16xf32> to vector<16xf32>
    %56 = vector.shape_cast %55 : vector<16xf32> to vector<16x1xf32>
    %57 = vector.broadcast %56 : vector<16x1xf32> to vector<16x16xf32>
    %58 = arith.cmpf ole, %54, %57 : vector<16x16xf32>
    %cst_21 = arith.constant 1.600000e+01 : f32
    %59 = vector.broadcast %cst_21 : f32 to vector<16x16xf32>
    %60 = arith.select %58, %18, %59 : vector<16x16xi1>, vector<16x16xf32>
    %cst_22 = arith.constant dense<0x7F800000> : vector<16xf32>
    %61 = vector.multi_reduction <minimumf>, %60, %cst_22 [1] : vector<16x16xf32> to vector<16xf32>
    %62 = vector.shape_cast %61 : vector<16xf32> to vector<16x1xf32>
    %63 = vector.broadcast %62 : vector<16x1xf32> to vector<16x16xf32>
    %64 = arith.cmpf oeq, %18, %63 : vector<16x16xf32>
    %cst_23 = arith.constant 3.40282347E+38 : f32
    %65 = vector.broadcast %cst_23 : f32 to vector<16x16xf32>
    %66 = arith.select %64, %65, %54 : vector<16x16xi1>, vector<16x16xf32>
    %cst_24 = arith.constant dense<0x7F800000> : vector<16xf32>
    %67 = vector.multi_reduction <minimumf>, %66, %cst_24 [1] : vector<16x16xf32> to vector<16xf32>
    %68 = vector.shape_cast %67 : vector<16xf32> to vector<16x1xf32>
    %69 = vector.broadcast %68 : vector<16x1xf32> to vector<16x16xf32>
    %70 = arith.cmpf ole, %66, %69 : vector<16x16xf32>
    %cst_25 = arith.constant 1.600000e+01 : f32
    %71 = vector.broadcast %cst_25 : f32 to vector<16x16xf32>
    %72 = arith.select %70, %18, %71 : vector<16x16xi1>, vector<16x16xf32>
    %cst_26 = arith.constant dense<0x7F800000> : vector<16xf32>
    %73 = vector.multi_reduction <minimumf>, %72, %cst_26 [1] : vector<16x16xf32> to vector<16xf32>
    %74 = vector.shape_cast %73 : vector<16xf32> to vector<16x1xf32>
    %75 = vector.broadcast %74 : vector<16x1xf32> to vector<16x16xf32>
    %76 = arith.cmpf oeq, %18, %75 : vector<16x16xf32>
    %cst_27 = arith.constant 3.40282347E+38 : f32
    %77 = vector.broadcast %cst_27 : f32 to vector<16x16xf32>
    %78 = arith.select %76, %77, %66 : vector<16x16xi1>, vector<16x16xf32>
    %cst_28 = arith.constant dense<0x7F800000> : vector<16xf32>
    %79 = vector.multi_reduction <minimumf>, %78, %cst_28 [1] : vector<16x16xf32> to vector<16xf32>
    %80 = vector.shape_cast %79 : vector<16xf32> to vector<16x1xf32>
    %81 = vector.broadcast %80 : vector<16x1xf32> to vector<16x16xf32>
    %82 = arith.cmpf ole, %78, %81 : vector<16x16xf32>
    %cst_29 = arith.constant 1.600000e+01 : f32
    %83 = vector.broadcast %cst_29 : f32 to vector<16x16xf32>
    %84 = arith.select %82, %18, %83 : vector<16x16xi1>, vector<16x16xf32>
    %cst_30 = arith.constant dense<0x7F800000> : vector<16xf32>
    %85 = vector.multi_reduction <minimumf>, %84, %cst_30 [1] : vector<16x16xf32> to vector<16xf32>
    %86 = vector.shape_cast %85 : vector<16xf32> to vector<16x1xf32>
    %87 = vector.broadcast %86 : vector<16x1xf32> to vector<16x16xf32>
    %88 = arith.cmpf oeq, %18, %87 : vector<16x16xf32>
    %cst_31 = arith.constant 3.40282347E+38 : f32
    %89 = vector.broadcast %cst_31 : f32 to vector<16x16xf32>
    %90 = arith.select %88, %89, %78 : vector<16x16xi1>, vector<16x16xf32>
    %cst_32 = arith.constant dense<0x7F800000> : vector<16xf32>
    %91 = vector.multi_reduction <minimumf>, %90, %cst_32 [1] : vector<16x16xf32> to vector<16xf32>
    %92 = vector.shape_cast %91 : vector<16xf32> to vector<16x1xf32>
    %93 = vector.broadcast %92 : vector<16x1xf32> to vector<16x16xf32>
    %94 = arith.cmpf ole, %90, %93 : vector<16x16xf32>
    %cst_33 = arith.constant 1.600000e+01 : f32
    %95 = vector.broadcast %cst_33 : f32 to vector<16x16xf32>
    %96 = arith.select %94, %18, %95 : vector<16x16xi1>, vector<16x16xf32>
    %cst_34 = arith.constant dense<0x7F800000> : vector<16xf32>
    %97 = vector.multi_reduction <minimumf>, %96, %cst_34 [1] : vector<16x16xf32> to vector<16xf32>
    %98 = vector.shape_cast %97 : vector<16xf32> to vector<16x1xf32>
    %99 = tpu.concatenate %26, %50, %74, %98 in 1 : vector<16x1xf32>, vector<16x1xf32>, vector<16x1xf32>, vector<16x1xf32> -> vector<16x4xf32>
    %100 = arith.fptosi %99 : vector<16x4xf32> to vector<16x4xi32>
    %c0_35 = arith.constant 0 : index
    %c0_36 = arith.constant 0 : index
    %c0_37 = arith.constant 0 : index
    %101 = vector.load %arg4[%c0_35, %c0_36, %c0_37] : memref<1x16x4xi32, #tpu.memory_space<vmem>>, vector<1x16x4xi32>
    %102 = vector.shape_cast %101 : vector<1x16x4xi32> to vector<16x4xi32>
    %103 = vector.shape_cast %100 : vector<16x4xi32> to vector<1x16x4xi32>
    tpu.vector_store %arg4[%c0_35, %c0_36, %c0_37], %103 {strides = array<i32>} : memref<1x16x4xi32, #tpu.memory_space<vmem>>, vector<1x16x4xi32>,
    return
  }
  func.func @transform_0(%arg0: i32, %arg1: i32) -> (i32, i32, i32) {
    %c0_i32 = arith.constant 0 : i32
    %c0_i32_0 = arith.constant 0 : i32
    return %arg0, %arg1, %c0_i32 : i32, i32, i32
  }
  func.func @transform_1(%arg0: i32, %arg1: i32) -> (i32, i32, i32) {
    %c0_i32 = arith.constant 0 : i32
    %c0_i32_0 = arith.constant 0 : i32
    %c0_i32_1 = arith.constant 0 : i32
    return %arg0, %c0_i32, %c0_i32_0 : i32, i32, i32
  }
  func.func @transform_2(%arg0: i32, %arg1: i32) -> (i32, i32, i32) {
    %c0_i32 = arith.constant 0 : i32
    %c0_i32_0 = arith.constant 0 : i32
    return %arg0, %arg1, %c0_i32 : i32, i32, i32
  }
}

</mosaic_0001>

<bundles_post_ra>
// kernel: tpu_custom_call.1
= control target key start
LH: loop header
LB: loop body
LE: loop exit
PB: predicated region body
PF: predicated region fallthrough
CT: control target
= control target key end

     0   :  { %s632_s9 = smov 0   ;;  %s634_s10 = smov 0   ;;  %s757_s0 = inlined_call_operand.vmem [shape: f32[2,16,4], index: 0, kind: input, shape index: {}]   ;;  %s758_s1 = inlined_call_operand.vmem [shape: f32[2,16,4], index: 1, kind: input, shape index: {}]   ;;  %s759_s2 = inlined_call_operand.vmem [shape: s32[2,16,4], index: 2, kind: output, shape index: {}]  }
   0x1   :  { %s636_s11 = smov 0  }
   0x2 LB: > { %s24_s12 = sadd.s32 1, %s611_s10  ;;  %p541_p0 = scmp.ge.s32.totalorder %s615_s11, 1  ;;  %s615_s11 = sphi %s636_s11, %s12_s11   ;;  %s611_s10 = sphi %s634_s10, %s761_s10   ;;  %s607_s9 = sphi %s632_s9, %s760_s9  }
   0x3   : > { %p26_p1 = scmp.ge.s32.totalorder %s24_s12, 2  ;;  %p143_p2 = scmp.lt.s32.totalorder %s615_s11, 3 }
   0x5   : > { %s763_s12 = smov (%p26_p1, %s24_s12), 0  ;;  %p144_p3 = pnand %p541_p0, %p143_p2 }
   0x6   : > { %p179_p4 = scmp.lt.s32.totalorder (!%p144_p3), %s607_s9, 1 }
   0x7   : > { %147 = sbr.rel (%p144_p3) target bundleno = 1834 (0x72a), region = 28 }
   0xc   : > { %s765_s9 = smov (!%p179_p4, %s607_s9), 1  ;;  %vm207_vm0 = vcmask 31744   ;;  %v265_v13 = vlaneseq  ;;  %vm270_vm1 = vcmask 130112   ;;  %vm288_vm2 = vcmask 130048  }
   0xd   : > { %s650_s13 = sshll.u32 %s765_s9, 4 }
   0xe   : > { %s192_s16 = scalar_lea.vmem %s758_s1, %s650_s13  ;;  %s186_s19 = scalar_lea.vmem %s757_s0, %s650_s13  ;;  %v266_v14 = vand.u32 127, %v265_v13 }
   0xf   : > { %v205_v0 = vld [vmem:[%s192_s16] sm:$0xff]  ;;  %v206_v1 = vld [vmem:[%s192_s16 + $0x8] sm:$0xff]  ;;  %s201_s22 = scalar_lea.vmem %s759_s2, %s650_s13 }
  0x10   : > { %548 = vmatpush.xpose.msk.msra.mxu0 %vm207_vm0, %v206_v1  ;;  %557 = vmatpush.xpose.msk.msra.mxu1 %vm207_vm0, %v206_v1  ;;  %v251_v2 = vmul.f32 %v205_v0, %v205_v0  ;;  %v203_v3 = vld [vmem:[%s186_s19] sm:$0xff]  ;;  %v204_v7 = vld [vmem:[%s186_s19 + $0x8] sm:$0xff]  ;;  %v252_v8 = vmul.f32 %v206_v1, %v206_v1  ;;  %v268_v16 = vadd.s32 4294967288, %v266_v14  ;;  %v672_v32 = vcvt.s32.f32 %v266_v14 }
  0x11   : > { %v243_v4 = vmul.f32 %v203_v3, %v203_v3  ;;  %v244_v9 = vmul.f32 %v204_v7, %v204_v7 }
  0x12   : > { %v253_v5 = vsel %vm207_vm0, %v251_v2, 0.0  ;;  %v256_v10 = vsel %vm207_vm0, %v252_v8, 0.0 }
  0x13   : > { %254 = vadd.xlane.f32.xlu0 %v253_v5  ;;  %v245_v6 = vsel %vm207_vm0, %v243_v4, 0.0  ;;  %v248_v11 = vsel %vm207_vm0, %v244_v9, 0.0 }
  0x14   : > { %549 = vmatpush.xpose.msk.msra.mxu0 %vm207_vm0, %v205_v0  ;;  %558 = vmatpush.xpose.msk.msra.mxu1 %vm207_vm0, %v205_v0 }
  0x15   : > { %246 = vadd.xlane.f32.xlu1 %v245_v6 }
  0x17   : > { %550 = vmatmul.msk.f32.vlgmr.msra.gmra.mxu0 %vm207_vm0, %v203_v3  ;;  %551 = vmatmul.msk.f32.vlgmr.msra.gmra.mxu1 %vm207_vm0, %v204_v7 }
  0x1b   : > { %257 = vadd.xlane.f32.xlu0 %v256_v10 }
  0x1d   : > { %249 = vadd.xlane.f32.xlu1 %v248_v11 }
  0x86   : > { %v255_v12 = vpop.xlane.xlu0 %254 }
  0x87   : > { %v267_v18 = vperm.slane %v255_v12, %v266_v14 }
  0x88   : > { %v247_v15 = vpop.xlane.xlu1 %246 }
  0x8e   : > { %v258_v17 = vpop.xlane.xlu0 %257 }
  0x8f   : > { %v269_v19 = vperm.slane %v258_v17, %v268_v16 }
  0x90   : > { %v250_v26 = vpop.xlane.xlu1 %249 }
  0x91   : > { %v271_v25 = vsel %vm270_vm1, %v269_v19, %v267_v18 }
  0x94   : > { %v237_v20 = vpop.f32.mrf.mxu0  ;;  %v240_v21 = vpop.f32.mrf.mxu1 }
  0x95   : > { %v259_v22 = vmul.f32 2.0, %v237_v20  ;;  %v260_v24 = vmul.f32 2.0, %v240_v21 }
  0x97   : > { %v261_v23 = vsub.f32 %v247_v15, %v259_v22  ;;  %v262_v28 = vsub.f32 %v250_v26, %v260_v24 }
  0x99   : > { %v285_v27 = vadd.f32 %v271_v25, %v261_v23  ;;  %v286_v30 = vadd.f32 %v271_v25, %v262_v28 }
  0x9b   : > { %v289_v29 = vsel %vm288_vm2, %v285_v27, inf  ;;  %v292_v31 = vsel %vm288_vm2, %v286_v30, inf }
  0x9c   : > { %290 = vmin.xlane.f32.xlu2 %v289_v29 }
  0xa4   : > { %293 = vmin.xlane.f32.xlu2 %v292_v31 }
 0x10f   : > { %v291_v33 = vpop.xlane.xlu2 %290 }
 0x110   : > { %vm295_vm3 = vcmp.le.f32.partialorder %v285_v27, %v291_v33 }
 0x111   : > { %v297_v34 = vsel %vm295_vm3, %v672_v32, 16.0 }
 0x112   : > { %v299_v35 = vsel %vm288_vm2, %v297_v34, inf }
 0x113   : > { %300 = vmin.xlane.f32.xlu0 %v299_v35 }
 0x117   : > { %v294_v36 = vpop.xlane.xlu2 %293 }
 0x118   : > { %vm296_vm4 = vcmp.le.f32.partialorder %v286_v30, %v294_v36 }
 0x119   : > { %v298_v37 = vsel %vm296_vm4, %v672_v32, 16.0 }
 0x11a   : > { %v302_v38 = vsel %vm288_vm2, %v298_v37, inf }
 0x11b   : > { %303 = vmin.xlane.f32.xlu1 %v302_v38 }
 0x186   : > { %v678_v39 = vpop.xlane.xlu0 %300 }
 0x187   : > { %vm305_vm5 = vcmp.eq.f32.partialorder %v672_v32, %v678_v39 }
 0x188   : > { %v307_v40 = vsel %vm305_vm5, 3.4028235e+38, %v285_v27 }
 0x189   : > { %v309_v41 = vsel %vm288_vm2, %v307_v40, inf }
 0x18a   : > { %310 = vmin.xlane.f32.xlu2 %v309_v41 }
 0x18e   : > { %v683_v42 = vpop.xlane.xlu1 %303 }
 0x18f   : > { %vm306_vm6 = vcmp.eq.f32.partialorder %v672_v32, %v683_v42 }
 0x190   : > { %v308_v43 = vsel %vm306_vm6, 3.4028235e+38, %v286_v30 }
 0x191   : > { %v312_v44 = vsel %vm288_vm2, %v308_v43, inf }
 0x192   : > { %313 = vmin.xlane.f32.xlu0 %v312_v44 }
 0x1fd   : > { %v311_v45 = vpop.xlane.xlu2 %310 }
 0x1fe   : > { %vm315_vm7 = vcmp.le.f32.partialorder %v307_v40, %v311_v45 }
 0x1ff   : > { %v317_v46 = vsel %vm315_vm7, %v672_v32, 16.0 }
 0x200   : > { %v319_v47 = vsel %vm288_vm2, %v317_v46, inf }
 0x201   : > { %320 = vmin.xlane.f32.xlu1 %v319_v47 }
 0x205   : > { %v314_v48 = vpop.xlane.xlu0 %313 }
 0x206   : > { %vm316_vm8 = vcmp.le.f32.partialorder %v308_v43, %v314_v48 }
 0x207   : > { %v318_v49 = vsel %vm316_vm8, %v672_v32, 16.0 }
 0x208   : > { %v322_v50 = vsel %vm288_vm2, %v318_v49, inf }
 0x209   : > { %323 = vmin.xlane.f32.xlu2 %v322_v50 }
 0x274   : > { %v321_v51 = vpop.xlane.xlu1 %320 }
 0x275   : > { %vm325_vm9 = vcmp.eq.f32.partialorder %v672_v32, %v321_v51 }
 0x276   : > { %v327_v52 = vsel %vm325_vm9, 3.4028235e+38, %v307_v40 }
 0x277   : > { %v329_v53 = vsel %vm288_vm2, %v327_v52, inf }
 0x278   : > { %330 = vmin.xlane.f32.xlu0 %v329_v53 }
 0x27c   : > { %v324_v54 = vpop.xlane.xlu2 %323 }
 0x27d   : > { %vm326_vm10 = vcmp.eq.f32.partialorder %v672_v32, %v324_v54 }
 0x27e   : > { %v328_v55 = vsel %vm326_vm10, 3.4028235e+38, %v308_v43 }
 0x27f   : > { %v332_v56 = vsel %vm288_vm2, %v328_v55, inf }
 0x280   : > { %333 = vmin.xlane.f32.xlu1 %v332_v56 }
 0x2eb   : > { %v331_v57 = vpop.xlane.xlu0 %330 }
 0x2ec   : > { %vm335_vm11 = vcmp.le.f32.partialorder %v327_v52, %v331_v57 }
 0x2ed   : > { %v337_v58 = vsel %vm335_vm11, %v672_v32, 16.0 }
 0x2ee   : > { %v339_v59 = vsel %vm288_vm2, %v337_v58, inf }
 0x2ef   : > { %340 = vmin.xlane.f32.xlu2 %v339_v59 }
 0x2f3   : > { %v334_v60 = vpop.xlane.xlu1 %333 }
 0x2f4   : > { %vm336_vm12 = vcmp.le.f32.partialorder %v328_v55, %v334_v60 }
 0x2f5   : > { %v338_v61 = vsel %vm336_vm12, %v672_v32, 16.0 }
 0x2f6   : > { %v342_v62 = vsel %vm288_vm2, %v338_v61, inf }
 0x2f7   : > { %343 = vmin.xlane.f32.xlu0 %v342_v62 }
 0x362   : > { %v700_v63 = vpop.xlane.xlu2 %340 }
 0x363   : > { %vm345_vm13 = vcmp.eq.f32.partialorder %v672_v32, %v700_v63 }
 0x364   : > { %v347_v0 = vsel %vm345_vm13, 3.4028235e+38, %v327_v52 }
 0x365   : > { %v349_v1 = vsel %vm288_vm2, %v347_v0, inf }
 0x366   : > { %350 = vmin.xlane.f32.xlu1 %v349_v1 }
 0x36a   : > { %v705_v2 = vpop.xlane.xlu0 %343 }
 0x36b   : > { %vm346_vm14 = vcmp.eq.f32.partialorder %v672_v32, %v705_v2 }
 0x36c   : > { %v348_v3 = vsel %vm346_vm14, 3.4028235e+38, %v328_v55 }
 0x36d   : > { %v352_v4 = vsel %vm288_vm2, %v348_v3, inf }
 0x36e   : > { %353 = vmin.xlane.f32.xlu2 %v352_v4 }
 0x3d9   : > { %v351_v5 = vpop.xlane.xlu1 %350 }
 0x3da   : > { %vm355_vm15 = vcmp.le.f32.partialorder %v347_v0, %v351_v5 }
 0x3db   : > { %v357_v6 = vsel %vm355_vm15, %v672_v32, 16.0  ;;  %vm425_vm15 = vcmask 7168  }
 0x3dc   : > { %v359_v7 = vsel %vm288_vm2, %v357_v6, inf  ;;  %v426_v50 = vsel %vm425_vm15, %v678_v39, %v700_v63  ;;  %v427_v57 = vsel %vm425_vm15, %v683_v42, %v705_v2 }
 0x3dd   : > { %360 = vmin.xlane.f32.xlu0 %v359_v7 }
 0x3e1   : > { %v354_v8 = vpop.xlane.xlu2 %353 }
 0x3e2   : > { %vm356_vm1 = vcmp.le.f32.partialorder %v348_v3, %v354_v8 }
 0x3e3   : > { %v358_v9 = vsel %vm356_vm1, %v672_v32, 16.0  ;;  %vm428_vm1 = vcmask 15360  }
 0x3e4   : > { %v362_v10 = vsel %vm288_vm2, %v358_v9, inf }
 0x3e5   : > { %363 = vmin.xlane.f32.xlu1 %v362_v10 }
 0x450   : > { %v361_v11 = vpop.xlane.xlu0 %360 }
 0x451   : > { %vm365_vm3 = vcmp.eq.f32.partialorder %v672_v32, %v361_v11 }
 0x452   : > { %v367_v12 = vsel %vm365_vm3, 3.4028235e+38, %v347_v0  ;;  %vm431_vm3 = vcmask 23552  }
 0x453   : > { %v369_v13 = vsel %vm288_vm2, %v367_v12, inf }
 0x454   : > { %370 = vmin.xlane.f32.xlu2 %v369_v13 }
 0x458   : > { %v364_v14 = vpop.xlane.xlu1 %363 }
 0x459   : > { %vm366_vm4 = vcmp.eq.f32.partialorder %v672_v32, %v364_v14 }
 0x45a   : > { %v368_v15 = vsel %vm366_vm4, 3.4028235e+38, %v348_v3 }
 0x45b   : > { %v372_v16 = vsel %vm288_vm2, %v368_v15, inf }
 0x45c   : > { %373 = vmin.xlane.f32.xlu0 %v372_v16 }
 0x4c7   : > { %v371_v17 = vpop.xlane.xlu2 %370 }
 0x4c8   : > { %vm375_vm5 = vcmp.le.f32.partialorder %v367_v12, %v371_v17 }
 0x4c9   : > { %v377_v18 = vsel %vm375_vm5, %v672_v32, 16.0 }
 0x4ca   : > { %v379_v19 = vsel %vm288_vm2, %v377_v18, inf }
 0x4cb   : > { %380 = vmin.xlane.f32.xlu1 %v379_v19 }
 0x4cf   : > { %v374_v20 = vpop.xlane.xlu0 %373 }
 0x4d0   : > { %vm376_vm6 = vcmp.le.f32.partialorder %v368_v15, %v374_v20 }
 0x4d1   : > { %v378_v21 = vsel %vm376_vm6, %v672_v32, 16.0 }
 0x4d2   : > { %v382_v22 = vsel %vm288_vm2, %v378_v21, inf }
 0x4d3   : > { %383 = vmin.xlane.f32.xlu2 %v382_v22 }
 0x53e   : > { %v381_v23 = vpop.xlane.xlu1 %380 }
 0x53f   : > { %vm385_vm7 = vcmp.eq.f32.partialorder %v672_v32, %v381_v23  ;;  %v429_v51 = vsel %vm428_vm1, %v426_v50, %v381_v23 }
 0x540   : > { %v387_v24 = vsel %vm385_vm7, 3.4028235e+38, %v367_v12 }
 0x541   : > { %v389_v25 = vsel %vm288_vm2, %v387_v24, inf }
 0x542   : > { %390 = vmin.xlane.f32.xlu0 %v389_v25 }
 0x546   : > { %v384_v26 = vpop.xlane.xlu2 %383 }
 0x547   : > { %vm386_vm8 = vcmp.eq.f32.partialorder %v672_v32, %v384_v26  ;;  %v430_v58 = vsel %vm428_vm1, %v427_v57, %v384_v26 }
 0x548   : > { %v388_v27 = vsel %vm386_vm8, 3.4028235e+38, %v368_v15 }
 0x549   : > { %v392_v28 = vsel %vm288_vm2, %v388_v27, inf }
 0x54a   : > { %393 = vmin.xlane.f32.xlu1 %v392_v28 }
 0x5b5   : > { %v391_v29 = vpop.xlane.xlu0 %390 }
 0x5b6   : > { %vm395_vm9 = vcmp.le.f32.partialorder %v387_v24, %v391_v29 }
 0x5b7   : > { %v397_v30 = vsel %vm395_vm9, %v672_v32, 16.0 }
 0x5b8   : > { %v399_v31 = vsel %vm288_vm2, %v397_v30, inf }
 0x5b9   : > { %400 = vmin.xlane.f32.xlu2 %v399_v31 }
 0x5bd   : > { %v394_v33 = vpop.xlane.xlu1 %393 }
 0x5be   : > { %vm396_vm10 = vcmp.le.f32.partialorder %v388_v27, %v394_v33 }
 0x5bf   : > { %v398_v34 = vsel %vm396_vm10, %v672_v32, 16.0 }
 0x5c0   : > { %v402_v35 = vsel %vm288_vm2, %v398_v34, inf }
 0x5c1   : > { %403 = vmin.xlane.f32.xlu0 %v402_v35 }
 0x62c   : > { %v401_v36 = vpop.xlane.xlu2 %400 }
 0x62d   : > { %vm405_vm11 = vcmp.eq.f32.partialorder %v672_v32, %v401_v36 }
 0x62e   : > { %v407_v37 = vsel %vm405_vm11, 3.4028235e+38, %v387_v24 }
 0x62f   : > { %v409_v38 = vsel %vm288_vm2, %v407_v37, inf }
 0x630   : > { %410 = vmin.xlane.f32.xlu1 %v409_v38 }
 0x634   : > { %v404_v40 = vpop.xlane.xlu0 %403 }
 0x635   : > { %vm406_vm12 = vcmp.eq.f32.partialorder %v672_v32, %v404_v40 }
 0x636   : > { %v408_v41 = vsel %vm406_vm12, 3.4028235e+38, %v388_v27 }
 0x637   : > { %v412_v43 = vsel %vm288_vm2, %v408_v41, inf }
 0x638   : > { %413 = vmin.xlane.f32.xlu2 %v412_v43 }
 0x6a3   : > { %v411_v44 = vpop.xlane.xlu1 %410 }
 0x6a4   : > { %vm415_vm13 = vcmp.le.f32.partialorder %v407_v37, %v411_v44 }
 0x6a5   : > { %v417_v45 = vsel %vm415_vm13, %v672_v32, 16.0 }
 0x6a6   : > { %v419_v46 = vsel %vm288_vm2, %v417_v45, inf }
 0x6a7   : > { %420 = vmin.xlane.f32.xlu0 %v419_v46 }
 0x6ab   : > { %v414_v47 = vpop.xlane.xlu2 %413 }
 0x6ac   : > { %vm416_vm14 = vcmp.le.f32.partialorder %v408_v41, %v414_v47 }
 0x6ad   : > { %v418_v48 = vsel %vm416_vm14, %v672_v32, 16.0 }
 0x6ae   : > { %v422_v49 = vsel %vm288_vm2, %v418_v48, inf }
 0x6af   : > { %423 = vmin.xlane.f32.xlu1 %v422_v49 }
 0x71a   : > { %v421_v52 = vpop.xlane.xlu0 %420 }
 0x71b   : > { %v432_v53 = vsel %vm431_vm3, %v429_v51, %v421_v52 }
 0x71c   : > { %vm559_vm4 = vcmp.lt.s32.totalorder %v432_v53, 0  ;;  %v560_v54 = vceil.f32 %v432_v53  ;;  %v561_v55 = vfloor.f32 %v432_v53 }
 0x71e   : > { %v562_v32 = vsel %vm559_vm4, %v560_v54, %v561_v55 }
 0x71f   : > { %v563_v56 = vcvt.f32.s32 %v562_v32 }
 0x721   : > { %436 = vst.msk [vmem:[%s201_s22] sm:$0xff] %vm207_vm0, %v563_v56 }
 0x722   : > { %v424_v59 = vpop.xlane.xlu1 %423 }
 0x723   : > { %v433_v39 = vsel %vm431_vm3, %v430_v58, %v424_v59 }
 0x724   : > { %vm564_vm2 = vcmp.lt.s32.totalorder %v433_v39, 0  ;;  %v565_v60 = vceil.f32 %v433_v39  ;;  %v566_v61 = vfloor.f32 %v433_v39 }
 0x726   : > { %v567_v62 = vsel %vm564_vm2, %v565_v60, %v566_v61 }
 0x727   : > { %v568_v63 = vcvt.f32.s32 %v567_v62 }
 0x729   : > { %437 = vst.msk [vmem:[%s201_s22 + $0x8] sm:$0xff] %vm207_vm0, %v568_v63 }
 0x72a PF: > { %s12_s11 = sadd.s32 1, %s615_s11   ;;  %s760_s9 = smov %s611_s10 }
 0x72b   : > { %p9_p5 = scmp.ge.s32.totalorder %s12_s11, 4   ;;  %s761_s10 = smov %s763_s12 }
 0x72d   :  { %11 = sbr.rel (!%p9_p5) target bundleno = 2 (0x2), region = 61 }

</bundles_post_ra>
